<compile_context>
chip_gen: v7x
topology: tpu7x:2x2x1
jax: 0.10.0
libtpu: 0.0.40
codegen_flags: <defaults>
</compile_context>

<pallas_src>
import jax
import jax.numpy as jnp
from jax.experimental import pallas as pl
from jax.experimental.pallas import tpu as pltpu

_LANE = 128


def _round_up(v, m):
    return ((v + m - 1) // m) * m


# ----------------------------- Pallas kernels ------------------------------ #
def _layer1_kernel(a_ref, xw_ref, b1_ref, w2_ref, hw_ref, acc_ref):
    """Row-tile of  hw = relu(A @ XW + b1) @ W2_fused  (K-reduction over grid axis 1)."""
    k = pl.program_id(1)

    @pl.when(k == 0)
    def _init():
        acc_ref[...] = jnp.zeros_like(acc_ref)

    acc_ref[...] += jnp.dot(a_ref[...], xw_ref[...],
                            preferred_element_type=jnp.float32)

    @pl.when(k == pl.num_programs(1) - 1)
    def _finish():
        h = jnp.maximum(acc_ref[...] + b1_ref[...], 0.0).astype(jnp.bfloat16)
        hw_ref[...] = jnp.dot(h, w2_ref[...],
                              preferred_element_type=jnp.float32
                              ).astype(hw_ref.dtype)


def _layer2_kernel(a_ref, hw_ref, b2_ref, o_ref, acc_ref):
    """Row-tile of  out = A @ HW + b2  (mu | logvar packed on the lane axis)."""
    k = pl.program_id(1)

    @pl.when(k == 0)
    def _init():
        acc_ref[...] = jnp.zeros_like(acc_ref)

    acc_ref[...] += jnp.dot(a_ref[...], hw_ref[...],
                            preferred_element_type=jnp.float32)

    @pl.when(k == pl.num_programs(1) - 1)
    def _finish():
        o_ref[...] = (acc_ref[...] + b2_ref[...]).astype(o_ref.dtype)


def _agg_call(kernel, a, operands, out_c, out_dtype, tile, extra_flops=0):
    """Shared pallas_call builder: grid (rows, K), A streamed, operands resident/sliced."""
    n_p = a.shape[0]
    grid = (n_p // tile, n_p // tile)

    m = operands[0]
    flops = 2 * n_p * n_p * m.shape[1] + n_p * out_c + extra_flops
    bytes_accessed = (a.size * a.dtype.itemsize
                      + sum(o.size * o.dtype.itemsize for o in operands)
                      + n_p * out_c * jnp.dtype(out_dtype).itemsize)

    in_specs = [pl.BlockSpec((tile, tile), lambda i, k: (i, k))]          # A tile
    in_specs.append(pl.BlockSpec((tile, m.shape[1]), lambda i, k: (k, 0)))  # M k-slab
    for o in operands[1:]:                                                # resident small tensors
        in_specs.append(pl.BlockSpec(o.shape, lambda i, k: (0, 0)))

    return pl.pallas_call(
        kernel,
        out_shape=jax.ShapeDtypeStruct((n_p, out_c), out_dtype),
        grid_spec=pltpu.PrefetchScalarGridSpec(
            num_scalar_prefetch=0,
            grid=grid,
            in_specs=in_specs,
            out_specs=pl.BlockSpec((tile, out_c), lambda i, k: (i, 0)),
            scratch_shapes=[pltpu.VMEM((tile, m.shape[1]), jnp.float32)],
        ),
        compiler_params=pltpu.CompilerParams(
            dimension_semantics=("parallel", "arbitrary"),
            vmem_limit_bytes=64 * 1024 * 1024,
        ),
        cost_estimate=pl.CostEstimate(
            flops=int(flops), transcendentals=0,
            bytes_accessed=int(bytes_accessed)),
    )(a, *operands)


# -------------------------------- Encoder ---------------------------------- #
def gcn_encoder(a_hat, x, params, *, tile=512):
    """Fused GCN VGAE encoder. Returns (mu, logvar), each [N, latent]."""
    n = x.shape[0]
    c_in = x.shape[1]
    hidden = params["w1"].shape[1]
    latent = params["w_mu"].shape[1]

    # --- lane-dense padding of channel dims (H -> 128, 2L -> 128) ---
    h_pad = _round_up(hidden, _LANE)
    l2_pad = _round_up(2 * latent, _LANE)

    w1 = jnp.zeros((c_in, h_pad), jnp.float32).at[:, :hidden].set(params["w1"])
    b1 = jnp.zeros((1, h_pad), jnp.float32).at[:, :hidden].set(
        params["b1"].reshape(1, -1))

    # fuse conv_mu | conv_logvar -> one [Hp, 2Lp] weight / bias
    w2 = jnp.zeros((h_pad, l2_pad), jnp.float32)
    w2 = w2.at[:hidden, :latent].set(params["w_mu"])
    w2 = w2.at[:hidden, latent:2 * latent].set(params["w_lv"])
    b2 = jnp.zeros((1, l2_pad), jnp.float32)
    b2 = b2.at[:, :latent].set(params["b_mu"].reshape(1, -1))
    b2 = b2.at[:, latent:2 * latent].set(params["b_lv"].reshape(1, -1))
    w2_bf16 = w2.astype(jnp.bfloat16)

    # --- pad N for tiling; cast adjacency to bf16 (f32 accumulation in-kernel) ---
    t = min(tile, _round_up(n, _LANE))
    n_pad = _round_up(n, t)
    a = jnp.zeros((n_pad, n_pad), jnp.float32).at[:n, :n].set(a_hat)
    a = a.astype(jnp.bfloat16)
    xp = jnp.zeros((n_pad, c_in), jnp.float32).at[:n].set(x)

    # Tiny (non lane-aligned C_in) feature transform in plain XLA.
    xw = jnp.dot(xp, w1, preferred_element_type=jnp.float32).astype(jnp.bfloat16)

    # Layer 1 + fused h@W2 epilogue:  hw = relu(A @ XW + b1) @ W2   -> [Np, 2Lp]
    hw = _agg_call(_layer1_kernel, a, (xw, b1, w2_bf16),
                   out_c=l2_pad, out_dtype=jnp.bfloat16, tile=t,
                   extra_flops=2 * n_pad * h_pad * l2_pad)

    # Layer 2:  out = A @ hw + b2   (mu | logvar)                   -> [Np, 2Lp]
    out = _agg_call(_layer2_kernel, a, (hw, b2),
                    out_c=l2_pad, out_dtype=jnp.float32, tile=t)

    mu = out[:n, :latent]
    logvar = out[:n, latent:2 * latent]
    return mu, logvar


# -------------------------------- JAX glue ---------------------------------- #
def build_norm_adj(edge_index, num_nodes):
    """Dense  D^-1/2 (A + I) D^-1/2  with A[i, j] = 1 for edge j -> i."""
    src = edge_index[0]
    dst = edge_index[1]
    a = jnp.zeros((num_nodes, num_nodes), jnp.float32)
    a = a.at[dst, src].add(1.0)                     # aggregate messages src -> dst
    a = a + jnp.eye(num_nodes, dtype=jnp.float32)   # add self-loops
    deg = a.sum(axis=1)
    dinv = jnp.where(deg > 0, 1.0 / jnp.sqrt(deg), 0.0)
    return dinv[:, None] * a * dinv[None, :]


def init_params(key, in_channels, hidden_channels, latent_dim):
    """Deterministic glorot-uniform weights, zero biases (GCNConv defaults)."""
    def glorot(k, fan_in, fan_out):
        limit = jnp.sqrt(6.0 / (fan_in + fan_out))
        return jax.random.uniform(k, (fan_in, fan_out), jnp.float32, -limit, limit)

    k1, k2, k3 = jax.random.split(key, 3)
    return {
        "w1":   glorot(k1, in_channels, hidden_channels),
        "b1":   jnp.zeros((1, hidden_channels), jnp.float32),
        "w_mu": glorot(k2, hidden_channels, latent_dim),
        "b_mu": jnp.zeros((1, latent_dim), jnp.float32),
        "w_lv": glorot(k3, hidden_channels, latent_dim),
        "b_lv": jnp.zeros((1, latent_dim), jnp.float32),
    }


def gcn_encoder_reference(a_hat, x, params):
    """Plain-JAX f32 reference for sanity checking."""
    h = jnp.maximum(a_hat @ (x @ params["w1"]) + params["b1"], 0.0)
    mu = a_hat @ (h @ params["w_mu"]) + params["b_mu"]
    lv = a_hat @ (h @ params["w_lv"]) + params["b_lv"]
    return mu, lv


# --------------------------------- main ------------------------------------- #
if __name__ == "__main__":
    in_channels, hidden_channels, latent_dim = 8, 32, 8
    num_nodes, num_edges = 16, 40

    key = jax.random.PRNGKey(0)
    k_x, k_src, k_dst, k_params = jax.random.split(key, 4)

    x = jax.random.normal(k_x, (num_nodes, in_channels), jnp.float32)
    edge_index = jnp.stack([
        jax.random.randint(k_src, (num_edges,), 0, num_nodes),
        jax.random.randint(k_dst, (num_edges,), 0, num_nodes),
    ]).astype(jnp.int32)                             # [2, E]

    params = init_params(k_params, in_channels, hidden_channels, latent_dim)
    a_hat = build_norm_adj(edge_index, num_nodes)

    mu, logvar = gcn_encoder(a_hat, x, params)
    jax.block_until_ready((mu, logvar))

    assert mu.shape == (num_nodes, latent_dim)
    assert logvar.shape == (num_nodes, latent_dim)

    # Loose check vs f32 reference (kernel uses bf16 inputs, f32 accumulation).
    mu_ref, lv_ref = gcn_encoder_reference(a_hat, x, params)
    assert jnp.allclose(mu, mu_ref, atol=5e-2, rtol=5e-2)
    assert jnp.allclose(logvar, lv_ref, atol=5e-2, rtol=5e-2)

    print("KERNEL_OK")
</pallas_src>

<mosaic_0001>
module attributes {stable_mosaic.version = 11 : i64} {
  func.func @_layer1_kernel(%arg0: i32, %arg1: i32, %arg2: memref<128x128xbf16, #tpu.memory_space<vmem>>, %arg3: memref<128x128xbf16, #tpu.memory_space<vmem>>, %arg4: memref<1x128xf32, #tpu.memory_space<vmem>>, %arg5: memref<128x128xbf16, #tpu.memory_space<vmem>>, %arg6: memref<128x128xbf16, #tpu.memory_space<vmem>>, %arg7: memref<128x128xf32, #tpu.memory_space<vmem>>) attributes {dimension_semantics = [#tpu.dimension_semantics<parallel>, #tpu.dimension_semantics<arbitrary>], iteration_bounds = array<i64: 1, 1>, scalar_prefetch = 0 : i64, scratch_operands = 1 : i64, tpu.core_type = #tpu.core_type<tc>, window_params = [{transform_indices = @transform_0, window_bounds = array<i64: 128, 128>}, {transform_indices = @transform_1, window_bounds = array<i64: 128, 128>}, {pipeline_mode = #tpu.pipeline_mode<synchronous>, transform_indices = @transform_2, window_bounds = array<i64: 1, 128>}, {pipeline_mode = #tpu.pipeline_mode<synchronous>, transform_indices = @transform_3, window_bounds = array<i64: 128, 128>}, {transform_indices = @transform_4, window_bounds = array<i64: 128, 128>}]} {
    %c0_i32 = arith.constant 0 : i32
    %0 = arith.cmpi eq, %arg1, %c0_i32 : i32
    %1 = arith.extui %0 : i1 to i32
    %c0_i32_0 = arith.constant 0 : i32
    %2 = arith.cmpi ne, %1, %c0_i32_0 : i32
    scf.if %2 {
      %cst_10 = arith.constant 0.000000e+00 : f32
      %12 = vector.broadcast %cst_10 : f32 to vector<128x128xf32>
      %c0_11 = arith.constant 0 : index
      %c0_12 = arith.constant 0 : index
      %13 = vector.load %arg7[%c0_11, %c0_12] : memref<128x128xf32, #tpu.memory_space<vmem>>, vector<128x128xf32>
      tpu.vector_store %arg7[%c0_11, %c0_12], %12 {strides = array<i32>} : memref<128x128xf32, #tpu.memory_space<vmem>>, vector<128x128xf32>,
    } else {
    }
    %c0 = arith.constant 0 : index
    %c0_1 = arith.constant 0 : index
    %3 = vector.load %arg7[%c0, %c0_1] : memref<128x128xf32, #tpu.memory_space<vmem>>, vector<128x128xf32>
    %c0_2 = arith.constant 0 : index
    %c0_3 = arith.constant 0 : index
    %4 = vector.load %arg2[%c0_2, %c0_3] : memref<128x128xbf16, #tpu.memory_space<vmem>>, vector<128x128xbf16>
    %c0_4 = arith.constant 0 : index
    %c0_5 = arith.constant 0 : index
    %5 = vector.load %arg3[%c0_4, %c0_5] : memref<128x128xbf16, #tpu.memory_space<vmem>>, vector<128x128xbf16>
    %cst = arith.constant dense<0.000000e+00> : vector<128x128xf32>
    %6 = tpu.matmul %4, %5, %cst {dimension_numbers = #tpu.dot_dimension_numbers<[1], [0], [0], [1], [0, 0, 1, 1], [], []>} : vector<128x128xbf16>, vector<128x128xbf16>, vector<128x128xf32> -> vector<128x128xf32>
    %7 = arith.addf %3, %6 : vector<128x128xf32>
    %c0_6 = arith.constant 0 : index
    %c0_7 = arith.constant 0 : index
    %8 = vector.load %arg7[%c0_6, %c0_7] : memref<128x128xf32, #tpu.memory_space<vmem>>, vector<128x128xf32>
    tpu.vector_store %arg7[%c0_6, %c0_7], %7 {strides = array<i32>} : memref<128x128xf32, #tpu.memory_space<vmem>>, vector<128x128xf32>,
    %c0_i32_8 = arith.constant 0 : i32
    %9 = arith.cmpi eq, %arg1, %c0_i32_8 : i32
    %10 = arith.extui %9 : i1 to i32
    %c0_i32_9 = arith.constant 0 : i32
    %11 = arith.cmpi ne, %10, %c0_i32_9 : i32
    scf.if %11 {
      %c0_10 = arith.constant 0 : index
      %c0_11 = arith.constant 0 : index
      %12 = vector.load %arg7[%c0_10, %c0_11] : memref<128x128xf32, #tpu.memory_space<vmem>>, vector<128x128xf32>
      %c0_12 = arith.constant 0 : index
      %c0_13 = arith.constant 0 : index
      %13 = vector.load %arg4[%c0_12, %c0_13] : memref<1x128xf32, #tpu.memory_space<vmem>>, vector<1x128xf32>
      %14 = vector.broadcast %13 : vector<1x128xf32> to vector<128x128xf32>
      %15 = arith.addf %12, %14 : vector<128x128xf32>
      %cst_14 = arith.constant 0.000000e+00 : f32
      %16 = vector.broadcast %cst_14 : f32 to vector<128x128xf32>
      %17 = arith.maximumf %15, %16 : vector<128x128xf32>
      %18 = arith.truncf %17 : vector<128x128xf32> to vector<128x128xbf16>
      %c0_15 = arith.constant 0 : index
      %c0_16 = arith.constant 0 : index
      %19 = vector.load %arg5[%c0_15, %c0_16] : memref<128x128xbf16, #tpu.memory_space<vmem>>, vector<128x128xbf16>
      %cst_17 = arith.constant dense<0.000000e+00> : vector<128x128xf32>
      %20 = tpu.matmul %18, %19, %cst_17 {dimension_numbers = #tpu.dot_dimension_numbers<[1], [0], [0], [1], [0, 0, 1, 1], [], []>} : vector<128x128xbf16>, vector<128x128xbf16>, vector<128x128xf32> -> vector<128x128xf32>
      %21 = arith.truncf %20 : vector<128x128xf32> to vector<128x128xbf16>
      %c0_18 = arith.constant 0 : index
      %c0_19 = arith.constant 0 : index
      %22 = vector.load %arg6[%c0_18, %c0_19] : memref<128x128xbf16, #tpu.memory_space<vmem>>, vector<128x128xbf16>
      tpu.vector_store %arg6[%c0_18, %c0_19], %21 {strides = array<i32>} : memref<128x128xbf16, #tpu.memory_space<vmem>>, vector<128x128xbf16>,
    } else {
    }
    return
  }
  func.func @transform_0(%arg0: i32, %arg1: i32) -> (i32, i32) {
    %c0_i32 = arith.constant 0 : i32
    return %arg0, %arg1 : i32, i32
  }
  func.func @transform_1(%arg0: i32, %arg1: i32) -> (i32, i32) {
    %c0_i32 = arith.constant 0 : i32
    %c0_i32_0 = arith.constant 0 : i32
    return %arg1, %c0_i32 : i32, i32
  }
  func.func @transform_2(%arg0: i32, %arg1: i32) -> (i32, i32) {
    %c0_i32 = arith.constant 0 : i32
    %c0_i32_0 = arith.constant 0 : i32
    %c0_i32_1 = arith.constant 0 : i32
    return %c0_i32, %c0_i32_0 : i32, i32
  }
  func.func @transform_3(%arg0: i32, %arg1: i32) -> (i32, i32) {
    %c0_i32 = arith.constant 0 : i32
    %c0_i32_0 = arith.constant 0 : i32
    %c0_i32_1 = arith.constant 0 : i32
    return %c0_i32, %c0_i32_0 : i32, i32
  }
  func.func @transform_4(%arg0: i32, %arg1: i32) -> (i32, i32) {
    %c0_i32 = arith.constant 0 : i32
    %c0_i32_0 = arith.constant 0 : i32
    return %arg0, %c0_i32 : i32, i32
  }
}

</mosaic_0001>

<bundles_post_ra>
// kernel: tpu_custom_call.1
= control target key start
LH: loop header
LB: loop body
LE: loop exit
PB: predicated region body
PF: predicated region fallthrough
CT: control target
= control target key end

     0   :  { %9 = vsyncpa [#allocation4], 0  ;;  %s1158_s0 = inlined_call_operand.hbm [shape: bf16[128,128], index: 0, kind: input, shape index: {}]   ;;  %s1159_s1 = inlined_call_operand.hbm [shape: bf16[128,128], index: 1, kind: input, shape index: {}]   ;;  %s1160_s2 = inlined_call_operand.hbm [shape: f32[1,128], index: 2, kind: input, shape index: {}]   ;;  %s1161_s3 = inlined_call_operand.hbm [shape: bf16[128,128], index: 3, kind: input, shape index: {}]   ;;  %s1162_s4 = inlined_call_operand.hbm [shape: bf16[128,128], index: 4, kind: output, shape index: {}]  }
   0x1   :  { %10 = vsyncpa [#allocation7], 0 }
   0x2   :  { %11 = vsyncpa [#allocation10], 0 }
   0x3   :  { %12 = vsyncpa [#allocation5], 0  ;;  %s1040_s15 = smov [#allocation6]   ;;  %s1041_s17 = smov [#allocation3]  }
   0x4   :  { %s30_s16 = sshll.u32 %s1040_s15, 4  ;;  %s18_s18 = sshll.u32 %s1041_s17, 4  ;;  %s31_s16 = int_to_ptr.vmem [resolvable:$true] %s30_s16  ;;  %s1072_s18 = int_to_ptr.vmem [resolvable:$true] %s18_s18 }
   0x5   :  { %s922_s21 = scalar_lea.hbm %s1159_s1, 1024 }
   0x6   :  { %p923_p0 = scmp.ne.s32.totalorder %s1159_s1, %s922_s21  ;;  %p926_p1 = scmp.lt.u32.totalorder %s922_s21, %s1159_s1 }
   0x8   :  { %p928_p2 = pnand %p926_p1, %p923_p0 }
   0xa   :  { %931 = shalt.err (!%p928_p2)
}
   0xb   :  { %s932_s26 = scalar_lea.vmem %s31_s16, 1024  ;;  %p937_p4 = scmp.lt.s32.totalorder %s31_s16, %s31_s16 }
   0xc   :  { %p933_p3 = scmp.ne.s32.totalorder %s31_s16, %s932_s26  ;;  %p938_p5 = scmp.lt.s32.totalorder %s932_s26, %s932_s26 }
   0xe   :  { %p939_p6 = por %p938_p5, %p937_p4 }
  0x10   :  { %p940_p7 = pnand %p939_p6, %p933_p3 }
  0x12   :  { %943 = shalt.err (!%p940_p7)
}
  0x13   :  { %s1042_s27 = smov 64   ;;  %s1043_s28 = smov 4  }
  0x14   :  { %36 = dma.hbm_to_vmem [thread:$0]  %s1159_s1, 1024, %s31_s16, [#allocation7], %s1042_s27, %s1042_s27, %s1043_s28  }
  0x15   :  { %s944_s7 = scalar_lea.hbm %s1158_s0, 1024 }
  0x16   :  { %p945_p8 = scmp.ne.s32.totalorder %s1158_s0, %s944_s7  ;;  %p948_p9 = scmp.lt.u32.totalorder %s944_s7, %s1158_s0 }
  0x18   :  { %p950_p10 = pnand %p948_p9, %p945_p8 }
  0x1a   :  { %953 = shalt.err (!%p950_p10)
}
  0x1b   :  { %s954_s12 = scalar_lea.vmem %s1072_s18, 1024  ;;  %p959_p12 = scmp.lt.s32.totalorder %s1072_s18, %s1072_s18 }
  0x1c   :  { %p955_p11 = scmp.ne.s32.totalorder %s1072_s18, %s954_s12  ;;  %p960_p13 = scmp.lt.s32.totalorder %s954_s12, %s954_s12 }
  0x1e   :  { %p961_p0 = por %p960_p13, %p959_p12 }
  0x20   :  { %p962_p1 = pnand %p961_p0, %p955_p11 }
  0x22   :  { %965 = shalt.err (!%p962_p1)
}
  0x23   :  { %24 = dma.hbm_to_vmem [thread:$0]  %s1158_s0, 1024, %s1072_s18, [#allocation4], %s1042_s27, %s1042_s27, %s1043_s28  }
  0x24   :  { %s1044_s14 = smov [#allocation8]   ;;  %s1045_s16 = smov [#allocation9]  }
  0x25   :  { %s43_s15 = sshll.u32 %s1044_s14, 4  ;;  %s52_s17 = sshll.u32 %s1045_s16, 4  ;;  %s44_s15 = int_to_ptr.vmem [resolvable:$true] %s43_s15  ;;  %s1109_s17 = int_to_ptr.vmem [resolvable:$true] %s52_s17 }
  0x26   :  { %s966_s21 = scalar_lea.hbm %s1160_s2, 16 }
  0x27   :  { %p967_p2 = scmp.ne.s32.totalorder %s1160_s2, %s966_s21  ;;  %p970_p3 = scmp.lt.u32.totalorder %s966_s21, %s1160_s2 }
  0x29   :  { %p972_p4 = pnand %p970_p3, %p967_p2 }
  0x2b   :  { %975 = shalt.err (!%p972_p4)
}
  0x2c   :  { %s976_s0 = scalar_lea.vmem %s44_s15, 16  ;;  %s980_s18 = scalar_lea.vmem %s44_s15, 32 }
  0x2d   :  { %p977_p5 = scmp.ne.s32.totalorder %s44_s15, %s976_s0  ;;  %p981_p6 = scmp.lt.s32.totalorder %s44_s15, %s44_s15 }
  0x2e   :  { %p982_p7 = scmp.lt.s32.totalorder %s980_s18, %s976_s0 }
  0x30   :  { %p983_p8 = por %p982_p7, %p981_p6 }
  0x32   :  { %p984_p9 = pnand %p983_p8, %p977_p5 }
  0x34   :  { %987 = shalt.err (!%p984_p9)
}
  0x35   :  { %46 = dma.hbm_to_vmem [thread:$0]  %s1160_s2, 16, %s44_s15, [#allocation7]  }
  0x36   :  { %s988_s6 = scalar_lea.hbm %s1161_s3, 1024 }
  0x37   :  { %p989_p10 = scmp.ne.s32.totalorder %s1161_s3, %s988_s6  ;;  %p992_p11 = scmp.lt.u32.totalorder %s988_s6, %s1161_s3 }
  0x39   :  { %p994_p12 = pnand %p992_p11, %p989_p10 }
  0x3b   :  { %997 = shalt.err (!%p994_p12)
}
  0x3c   :  { %s998_s11 = scalar_lea.vmem %s1109_s17, 1024  ;;  %p1003_p0 = scmp.lt.s32.totalorder %s1109_s17, %s1109_s17 }
  0x3d   :  { %p999_p13 = scmp.ne.s32.totalorder %s1109_s17, %s998_s11  ;;  %p1004_p1 = scmp.lt.s32.totalorder %s998_s11, %s998_s11 }
  0x3f   :  { %p1005_p2 = por %p1004_p1, %p1003_p0 }
  0x41   :  { %p1006_p3 = pnand %p1005_p2, %p999_p13 }
  0x43   :  { %1009 = shalt.err (!%p1006_p3)
}
  0x44   :  { %58 = dma.hbm_to_vmem [thread:$0]  %s1161_s3, 1024, %s1109_s17, [#allocation10], %s1042_s27, %s1042_s27, %s1043_s28  }
  0x45   :  { %1032 = dma.done.wait [#allocation4], 1024  }
  0x46   :  { %1033 = vsyncadd [#allocation4], 4294966272 }
  0x47   :  { %1034 = dma.done.wait [#allocation7], 1040  }
  0x48   :  { %1035 = vsyncadd [#allocation7], 4294966256 }
  0x49   :  { %1036 = dma.done.wait [#allocation10], 1024  }
  0x4a   :  { %1037 = vsyncadd [#allocation10], 4294966272  ;;  %v898_v0 = vld [vmem:[#allocation6] sm:$0xff]   ;;  %v899_v1 = vld [vmem:[#allocation6 + $0x8] sm:$0xff]   ;;  %s1046_s3 = smov [#allocation11]  }
  0x4b   :  { %827 = vmatprep.subr.bf16.mxu0 %v898_v0  ;;  %v900_v2 = vld [vmem:[#allocation6 + $0x10] sm:$0xff]   ;;  %v901_v3 = vld [vmem:[#allocation6 + $0x18] sm:$0xff]   ;;  %v906_v4 = vld [vmem:[#allocation3] sm:$0xff]   ;;  %s677_s1 = sshll.u32 %s1046_s3, 4  ;;  %s678_s1 = int_to_ptr.vmem [resolvable:$true] %s677_s1 }
  0x4c   :  { %828 = vmatpush3.bf16.msra.mxu0 %v898_v0  ;;  %843 = vmatprep.mubr.bf16.mxu0 %v906_v4  ;;  %v902_v5 = vld [vmem:[#allocation6 + $0x20] sm:$0xff]   ;;  %v903_v6 = vld [vmem:[#allocation6 + $0x28] sm:$0xff]   ;;  %v904_v9 = vld [vmem:[#allocation6 + $0x30] sm:$0xff]   ;;  %s1010_s13 = scalar_lea.vmem %s678_s1, 1024  ;;  %p1015_p5 = scmp.lt.s32.totalorder %s678_s1, %s678_s1 }
  0x4d   :  { %829 = vmatprep.subr.bf16.mxu0 %v899_v1  ;;  %v914_v7 = vld [vmem:[#allocation9] sm:$0xff]   ;;  %v915_v8 = vld [vmem:[#allocation9 + $0x8] sm:$0xff]   ;;  %v916_v10 = vld [vmem:[#allocation9 + $0x10] sm:$0xff]   ;;  %p1011_p4 = scmp.ne.s32.totalorder %s678_s1, %s1010_s13  ;;  %p1016_p6 = scmp.lt.s32.totalorder %s1010_s13, %s1010_s13 }
  0x4e   :  { %859 = vmatprep.subr.bf16.mxu1 %v914_v7  ;;  %v905_v11 = vld [vmem:[#allocation6 + $0x38] sm:$0xff]   ;;  %v918_v13 = vld [vmem:[#allocation9 + $0x20] sm:$0xff]   ;;  %v908_v15 = vld [vmem:[#allocation3 + $0x10] sm:$0xff]  }
  0x4f   :  { %860 = vmatpush3.bf16.msra.mxu1 %v914_v7  ;;  %v917_v12 = vld [vmem:[#allocation9 + $0x18] sm:$0xff]   ;;  %v907_v14 = vld [vmem:[#allocation3 + $0x8] sm:$0xff]   ;;  %v912_v20 = vld [vmem:[#allocation3 + $0x30] sm:$0xff]   ;;  %p1017_p7 = por %p1016_p6, %p1015_p5 }
  0x50   :  { %830 = vmatpush3.bf16.msra.mxu0 %v899_v1  ;;  %861 = vmatprep.subr.bf16.mxu1 %v915_v8  ;;  %v919_v16 = vld [vmem:[#allocation9 + $0x28] sm:$0xff]   ;;  %v909_v17 = vld [vmem:[#allocation3 + $0x18] sm:$0xff]   ;;  %v910_v18 = vld [vmem:[#allocation3 + $0x20] sm:$0xff]  }
  0x51   :  { %831 = vmatprep.subr.bf16.mxu0 %v900_v2  ;;  %v911_v19 = vld [vmem:[#allocation3 + $0x28] sm:$0xff]   ;;  %v913_v21 = vld [vmem:[#allocation3 + $0x38] sm:$0xff]   ;;  %v707_v24 = vld [vmem:[#allocation8] ss:$0 sm:$0xff]  ;;  %p1018_p8 = pnand %p1017_p7, %p1011_p4 }
  0x52   :  { %v920_v22 = vld [vmem:[#allocation9 + $0x30] sm:$0xff]   ;;  %v921_v23 = vld [vmem:[#allocation9 + $0x38] sm:$0xff]  }
  0x53   :  { %862 = vmatpush3.bf16.msra.mxu1 %v915_v8 }
  0x54   :  { %832 = vmatpush3.bf16.msra.mxu0 %v900_v2  ;;  %863 = vmatprep.subr.bf16.mxu1 %v916_v10 }
  0x55   :  { %833 = vmatprep.subr.bf16.mxu0 %v901_v3 }
  0x57   :  { %864 = vmatpush3.bf16.msra.mxu1 %v916_v10 }
  0x58   :  { %834 = vmatpush3.bf16.msra.mxu0 %v901_v3  ;;  %865 = vmatprep.subr.bf16.mxu1 %v917_v12 }
  0x59   :  { %835 = vmatprep.subr.bf16.mxu0 %v902_v5 }
  0x5b   :  { %866 = vmatpush3.bf16.msra.mxu1 %v917_v12 }
  0x5c   :  { %836 = vmatpush3.bf16.msra.mxu0 %v902_v5  ;;  %867 = vmatprep.subr.bf16.mxu1 %v918_v13 }
  0x5d   :  { %837 = vmatprep.subr.bf16.mxu0 %v903_v6 }
  0x5f   :  { %868 = vmatpush3.bf16.msra.mxu1 %v918_v13 }
  0x60   :  { %838 = vmatpush3.bf16.msra.mxu0 %v903_v6  ;;  %869 = vmatprep.subr.bf16.mxu1 %v919_v16 }
  0x61   :  { %839 = vmatprep.subr.bf16.mxu0 %v904_v9 }
  0x63   :  { %870 = vmatpush3.bf16.msra.mxu1 %v919_v16 }
  0x64   :  { %840 = vmatpush3.bf16.msra.mxu0 %v904_v9  ;;  %871 = vmatprep.subr.bf16.mxu1 %v920_v22 }
  0x65   :  { %841 = vmatprep.subr.bf16.mxu0 %v905_v11 }
  0x67   :  { %872 = vmatpush3.bf16.msra.mxu1 %v920_v22 }
  0x68   :  { %842 = vmatpush3.bf16.msra.mxu0 %v905_v11  ;;  %873 = vmatprep.subr.bf16.mxu1 %v921_v23 }
  0x6b   :  { %844 = vmatmul.mubr.bf16.vlgmr.msra.gmra.mrb[0].mxu0 %v907_v14  ;;  %874 = vmatpush3.bf16.msra.mxu1 %v921_v23 }
  0x6c   :  { %847 = vmatprep.mubr.bf16.mxu0 %v908_v15 }
  0x73   :  { %848 = vmatmul.mubr.bf16.gmra.mrb[4].mxu0 %v909_v17 }
  0x74   :  { %851 = vmatprep.mubr.bf16.mxu0 %v910_v18 }
  0x7b   :  { %852 = vmatmul.mubr.bf16.gmra.mrb[8].mxu0 %v911_v19 }
  0x7c   :  { %855 = vmatprep.mubr.bf16.mxu0 %v912_v20 }
  0x83   :  { %856 = vmatmul.mubr.bf16.gmra.mrb[12].mxu0 %v913_v21 }
 0x13e   :  { %v845_v25 = vpop.f32.mrb[0].mxu0 }
 0x13f   :  { %v393_v26 = vadd.f32 %v845_v25, %v707_v24  ;;  %v270_v27 = vpop.f32.mrb[1].mxu0 }
 0x140   :  { %v391_v28 = vadd.f32 %v707_v24, %v270_v27  ;;  %v846_v29 = vpop.f32.mrb[2].mxu0 }
 0x141   :  { %v394_v30 = vadd.f32 %v846_v29, %v707_v24  ;;  %v273_v31 = vpop.f32.mrb[3].mxu0  ;;  %v409_v33 = vmax.f32 %v393_v26, 0.0 }
 0x142   :  { %v392_v32 = vadd.f32 %v707_v24, %v273_v31  ;;  %v407_v35 = vmax.f32 %v391_v28, 0.0 }
 0x143   :  { %v410_v34 = vmax.f32 %v394_v30, 0.0 }
 0x144   :  { %v408_v36 = vmax.f32 %v392_v32, 0.0 }
 0x145   :  { %v424_v37 = vpack.c.bf16 %v410_v34, %v409_v33 }
 0x146   :  { %v849_v38 = vpop.f32.mrb[4].mxu0  ;;  %v423_v39 = vpack.c.bf16 %v408_v36, %v407_v35 }
 0x147   :  { %v397_v40 = vadd.f32 %v849_v38, %v707_v24  ;;  %v286_v41 = vpop.f32.mrb[5].mxu0 }
 0x148   :  { %v395_v42 = vadd.f32 %v707_v24, %v286_v41  ;;  %v850_v43 = vpop.f32.mrb[6].mxu0  ;;  %875 = vmatprep.mubr.bf16.mxu1 %v423_v39 }
 0x149   :  { %v398_v44 = vadd.f32 %v850_v43, %v707_v24  ;;  %v289_v45 = vpop.f32.mrb[7].mxu0  ;;  %876 = vmatmul.mubr.bf16.vlgmr.msra.gmra.mrb[0].mxu1 %v424_v37  ;;  %v413_v47 = vmax.f32 %v397_v40, 0.0 }
 0x14a   :  { %v396_v46 = vadd.f32 %v707_v24, %v289_v45  ;;  %v411_v49 = vmax.f32 %v395_v42, 0.0 }
 0x14b   :  { %v414_v48 = vmax.f32 %v398_v44, 0.0 }
 0x14c   :  { %v412_v50 = vmax.f32 %v396_v46, 0.0 }
 0x14d   :  { %v426_v51 = vpack.c.bf16 %v414_v48, %v413_v47 }
 0x14e   :  { %v425_v52 = vpack.c.bf16 %v412_v50, %v411_v49  ;;  %v853_v53 = vpop.f32.mrb[8].mxu0 }
 0x14f   :  { %v401_v54 = vadd.f32 %v853_v53, %v707_v24  ;;  %v302_v55 = vpop.f32.mrb[9].mxu0 }
 0x150   :  { %v399_v56 = vadd.f32 %v707_v24, %v302_v55  ;;  %v854_v57 = vpop.f32.mrb[10].mxu0  ;;  %879 = vmatprep.mubr.bf16.mxu1 %v425_v52 }
 0x151   :  { %v402_v58 = vadd.f32 %v854_v57, %v707_v24  ;;  %v305_v59 = vpop.f32.mrb[11].mxu0  ;;  %880 = vmatmul.mubr.bf16.gmra.mrb[4].mxu1 %v426_v51  ;;  %v417_v61 = vmax.f32 %v401_v54, 0.0 }
 0x152   :  { %v400_v60 = vadd.f32 %v707_v24, %v305_v59  ;;  %v415_v63 = vmax.f32 %v399_v56, 0.0 }
 0x153   :  { %v418_v62 = vmax.f32 %v402_v58, 0.0 }
 0x154   :  { %v416_v0 = vmax.f32 %v400_v60, 0.0 }
 0x155   :  { %v428_v1 = vpack.c.bf16 %v418_v62, %v417_v61 }
 0x156   :  { %v427_v2 = vpack.c.bf16 %v416_v0, %v415_v63  ;;  %v857_v3 = vpop.f32.mrb[12].mxu0 }
 0x157   :  { %v405_v4 = vadd.f32 %v857_v3, %v707_v24  ;;  %v318_v5 = vpop.f32.mrb[13].mxu0 }
 0x158   :  { %v403_v6 = vadd.f32 %v707_v24, %v318_v5  ;;  %v858_v7 = vpop.f32.mrb[14].mxu0  ;;  %883 = vmatprep.mubr.bf16.mxu1 %v427_v2 }
 0x159   :  { %v406_v8 = vadd.f32 %v858_v7, %v707_v24  ;;  %v321_v9 = vpop.f32.mrb[15].mxu0  ;;  %884 = vmatmul.mubr.bf16.gmra.mrb[8].mxu1 %v428_v1  ;;  %v421_v11 = vmax.f32 %v405_v4, 0.0 }
 0x15a   :  { %v404_v10 = vadd.f32 %v707_v24, %v321_v9  ;;  %v419_v13 = vmax.f32 %v403_v6, 0.0 }
 0x15b   :  { %v422_v12 = vmax.f32 %v406_v8, 0.0 }
 0x15c   :  { %v420_v14 = vmax.f32 %v404_v10, 0.0 }
 0x15d   :  { %v430_v15 = vpack.c.bf16 %v422_v12, %v421_v11 }
 0x15e   :  { %v429_v16 = vpack.c.bf16 %v420_v14, %v419_v13 }
 0x160   :  { %887 = vmatprep.mubr.bf16.mxu1 %v429_v16 }
 0x161   :  { %888 = vmatmul.mubr.bf16.gmra.mrb[12].mxu1 %v430_v15 }
 0x21c   :  { %v877_v17 = vpop.f32.mrb[0].mxu1 }
 0x21d   :  { %v529_v18 = vpop.f32.mrb[1].mxu1 }
 0x21e   :  { %v878_v19 = vpop.f32.mrb[2].mxu1 }
 0x21f   :  { %v756_v20 = vpack.c.bf16 %v878_v19, %v877_v17  ;;  %v532_v21 = vpop.f32.mrb[3].mxu1 }
 0x220   :  { %v751_v22 = vpack.c.bf16 %v532_v21, %v529_v18 }
 0x221   :  { %788 = vst [vmem:[#allocation11 + $0x8] sm:$0xff] %v756_v20  }
 0x222   :  { %752 = vst [vmem:[#allocation11] sm:$0xff] %v751_v22  }
 0x224   :  { %v881_v23 = vpop.f32.mrb[4].mxu1 }
 0x225   :  { %v545_v25 = vpop.f32.mrb[5].mxu1 }
 0x226   :  { %v882_v26 = vpop.f32.mrb[6].mxu1 }
 0x227   :  { %v766_v24 = vpack.c.bf16 %v882_v26, %v881_v23  ;;  %v548_v27 = vpop.f32.mrb[7].mxu1 }
 0x228   :  { %v761_v28 = vpack.c.bf16 %v548_v27, %v545_v25 }
 0x229   :  { %790 = vst [vmem:[#allocation11 + $0x18] sm:$0xff] %v766_v24  }
 0x22a   :  { %789 = vst [vmem:[#allocation11 + $0x10] sm:$0xff] %v761_v28  }
 0x22c   :  { %v885_v29 = vpop.f32.mrb[8].mxu1 }
 0x22d   :  { %v561_v30 = vpop.f32.mrb[9].mxu1 }
 0x22e   :  { %v886_v31 = vpop.f32.mrb[10].mxu1 }
 0x22f   :  { %v776_v32 = vpack.c.bf16 %v886_v31, %v885_v29  ;;  %v564_v33 = vpop.f32.mrb[11].mxu1 }
 0x230   :  { %v771_v34 = vpack.c.bf16 %v564_v33, %v561_v30 }
 0x231   :  { %792 = vst [vmem:[#allocation11 + $0x28] sm:$0xff] %v776_v32  }
 0x232   :  { %791 = vst [vmem:[#allocation11 + $0x20] sm:$0xff] %v771_v34  }
 0x234   :  { %v889_v35 = vpop.f32.mrb[12].mxu1 }
 0x235   :  { %v577_v36 = vpop.f32.mrb[13].mxu1 }
 0x236   :  { %v890_v37 = vpop.f32.mrb[14].mxu1 }
 0x237   :  { %v786_v38 = vpack.c.bf16 %v890_v37, %v889_v35  ;;  %v580_v39 = vpop.f32.mrb[15].mxu1 }
 0x238   :  { %v781_v40 = vpack.c.bf16 %v580_v39, %v577_v36 }
 0x239   :  { %794 = vst [vmem:[#allocation11 + $0x38] sm:$0xff] %v786_v38  }
 0x23a   :  { %793 = vst [vmem:[#allocation11 + $0x30] sm:$0xff] %v781_v40  }
 0x23b   :  { %1021 = shalt.err (!%p1018_p8)
}
 0x23c   :  { %s1022_s16 = scalar_lea.hbm %s1162_s4, 1024 }
 0x23d   :  { %p1023_p9 = scmp.ne.s32.totalorder %s1162_s4, %s1022_s16  ;;  %p1026_p10 = scmp.lt.u32.totalorder %s1022_s16, %s1162_s4 }
 0x23f   :  { %p1028_p11 = pnand %p1026_p10, %p1023_p9 }
 0x241   :  { %1031 = shalt.err (!%p1028_p11)
}
 0x242   :  { %683 = dma.vmem_to_hbm [thread:$0]  %s678_s1, 1024, %s1162_s4, [#allocation5], %s1042_s27, %s1042_s27, %s1043_s28  }
 0x243   :  { %1038 = dma.done.wait [#allocation5], 1024  }
 0x244   :  { %1039 = vsyncadd [#allocation5], 4294966272 }
 0x245   :  { %687 = vsyncpa [#allocation4], 1 }
 0x246   :  { %688 = vsyncpa [#allocation7], 1 }
 0x247   :  { %689 = vsyncpa [#allocation10], 1 }
 0x248   :  { %690 = vsyncpa [#allocation5], 1 }

</bundles_post_ra>
